<compile_context>
chip_gen: v5e
topology: v5e:2x2
jax: 0.10.0
libtpu: 0.0.40
codegen_flags: <defaults>
</compile_context>

<pallas_src>
import functools

import jax
import jax.numpy as jnp
from jax.experimental import pallas as pl
from jax.experimental.pallas import tpu as pltpu


def _birnn_kernel(x_ref, wih_ref, whh_ref, b_ref, out_ref, *, T, Bp, H):
    """Fused bidirectional tanh-RNN (whole sequence in one invocation).

    x_ref:   (T*Bp, D)    time-major flattened padded input (row = t*Bp + b)
    wih_ref: (D, 2H)      [W_ih_fwd | W_ih_bwd]   (already transposed in x out)
    whh_ref: (2H, 2H)     block-diagonal hidden->hidden weights
    b_ref:   (1, 2H)      folded biases [b_fwd | b_bwd], b = b_ih + b_hh
    out_ref: (T*Bp, 2H)   merged output: fwd in lanes [0,H), bwd in lanes [H,2H)
    """
    # Input projection for both directions, hoisted off the recurrence:
    # one big MXU matmul instead of 2*T tiny ones on the serial critical path.
    xp = (
        jnp.dot(x_ref[...], wih_ref[...], preferred_element_type=jnp.float32)
        + b_ref[...]
    )  # (T*Bp, 2H)

    whh_bd = whh_ref[...]  # (2H, 2H) block-diagonal, loop-invariant

    # Fused state: lanes [0,H) hold the forward chain, lanes [H,2H) the
    # backward chain (which consumes time in reverse order).
    h = jnp.zeros((Bp, 2 * H), jnp.float32)

    hs = []
    for t in range(T):
        tb = T - 1 - t  # backward direction consumes reversed time
        # Static, 8-aligned slices of the pre-computed projection; the lane
        # "concat" keeps each half in its native lane range (no lane shift).
        xp_t = jnp.concatenate(
            [xp[t * Bp:(t + 1) * Bp, :H], xp[tb * Bp:(tb + 1) * Bp, H:]],
            axis=-1,
        )  # (Bp, 2H)
        pre = xp_t + jnp.dot(h, whh_bd, preferred_element_type=jnp.float32)
        h = jnp.tanh(pre)
        hs.append(h)

    # Merged output slab: row block t = [fwd state at step t | bwd state at
    # step T-1-t] (i.e. the module's flip-back of the backward outputs),
    # written back with a single unmasked full-ref store.
    rows = [
        jnp.concatenate([hs[t][:, :H], hs[T - 1 - t][:, H:]], axis=-1)
        for t in range(T)
    ]
    out_ref[...] = jnp.concatenate(rows, axis=0).astype(out_ref.dtype)


def bidirectional_rnn(x, wih, whh, b):
    """Bidirectional vanilla-RNN forward pass (merge_mode='concat').

    Args:
      x:   (B, T, D)  float32, batch_first input (PyTorch convention).
      wih: (2, D, H)  input->hidden weights, [0]=forward layer, [1]=backward.
                      NOTE: transposed w.r.t. PyTorch's weight_ih_l0 (H, D).
      whh: (2, H, H)  hidden->hidden weights (transposed w.r.t. PyTorch).
      b:   (2, 1, H)  combined biases (bias_ih + bias_hh).

    Returns:
      (B, T, 2*H) concatenation of forward and (time-realigned) backward
      outputs, matching Bidirectional(nn.RNN, nn.RNN, merge_mode='concat').
    """
    B, T, D = x.shape
    H = wih.shape[-1]

    # Pad the batch to a multiple of 8 sublanes so every per-step slice of the
    # projection is tile-aligned. Padded rows are independent and discarded.
    Bp = max(8, ((B + 7) // 8) * 8)
    if Bp != B:
        x = jnp.pad(x, ((0, Bp - B), (0, 0), (0, 0)))

    # Time-major, flattened rows (row = t*Bp + b); stack the two directions'
    # input weights / biases along the output axis so the kernel projects both
    # directions in a single matmul.
    x2d = jnp.transpose(x, (1, 0, 2)).reshape(T * Bp, D)
    wih_cat = jnp.concatenate([wih[0], wih[1]], axis=-1)  # (D, 2H)
    b_cat = jnp.concatenate([b[0], b[1]], axis=-1)        # (1, 2H)

    # Block-diagonal hidden->hidden weights so one matmul advances both
    # (independent) direction chains.
    zeros = jnp.zeros((H, H), whh.dtype)
    whh_bd = jnp.concatenate(
        [
            jnp.concatenate([whh[0], zeros], axis=-1),
            jnp.concatenate([zeros, whh[1]], axis=-1),
        ],
        axis=0,
    )  # (2H, 2H)

    # Single grid step: the whole (small) problem is resident in VMEM; the
    # double-buffering BlockSpec would add is negligible at these shapes.
    out2d = pl.pallas_call(
        functools.partial(_birnn_kernel, T=T, Bp=Bp, H=H),
        out_shape=jax.ShapeDtypeStruct((T * Bp, 2 * H), jnp.float32),
        grid=(1,),
        in_specs=[
            pl.BlockSpec((T * Bp, D), lambda i: (0, 0)),
            pl.BlockSpec((D, 2 * H), lambda i: (0, 0)),
            pl.BlockSpec((2 * H, 2 * H), lambda i: (0, 0)),
            pl.BlockSpec((1, 2 * H), lambda i: (0, 0)),
        ],
        out_specs=pl.BlockSpec((T * Bp, 2 * H), lambda i: (0, 0)),
        compiler_params=pltpu.CompilerParams(
            dimension_semantics=("arbitrary",),
        ),
    )(x2d, wih_cat, whh_bd, b_cat)

    # (T*Bp, 2H) -> drop batch padding -> (B, T, 2H).
    out = out2d.reshape(T, Bp, 2 * H)[:, :B, :]
    return jnp.transpose(out, (1, 0, 2))


def _rnn_reference(x, wih, whh, b):
    """Pure-JAX single-direction tanh RNN (batch_first)."""

    def step(h, xt):
        h = jnp.tanh(xt @ wih + h @ whh + b)
        return h, h

    B = x.shape[0]
    H = wih.shape[1]
    h0 = jnp.zeros((B, H), jnp.float32)
    _, ys = jax.lax.scan(step, h0, jnp.swapaxes(x, 0, 1))
    return jnp.swapaxes(ys, 0, 1)


def _bidirectional_reference(x, wih, whh, b):
    fwd = _rnn_reference(x, wih[0], whh[0], b[0])
    bwd = _rnn_reference(jnp.flip(x, axis=1), wih[1], whh[1], b[1])
    bwd = jnp.flip(bwd, axis=1)
    return jnp.concatenate([fwd, bwd], axis=-1)


if __name__ == "__main__":
    # Small shapes consistent with the module's RNN usage.
    B, T, D, H = 2, 8, 16, 32

    key = jax.random.PRNGKey(0)
    kx, kwih, kwhh, kbih, kbhh = jax.random.split(key, 5)

    x = jax.random.normal(kx, (B, T, D), dtype=jnp.float32)

    # Deterministic parameter init, mimicking nn.RNN's U(-1/sqrt(H), 1/sqrt(H)).
    bound = 1.0 / jnp.sqrt(jnp.float32(H))
    # Stored as (direction, in, out) i.e. transposed vs. PyTorch's (H, D)/(H, H).
    wih = jax.random.uniform(kwih, (2, D, H), jnp.float32, -bound, bound)
    whh = jax.random.uniform(kwhh, (2, H, H), jnp.float32, -bound, bound)
    b_ih = jax.random.uniform(kbih, (2, 1, H), jnp.float32, -bound, bound)
    b_hh = jax.random.uniform(kbhh, (2, 1, H), jnp.float32, -bound, bound)
    b = b_ih + b_hh  # PyTorch adds both biases; fold into one

    out = jax.jit(bidirectional_rnn)(x, wih, whh, b)
    out = jax.block_until_ready(out)

    ref = _bidirectional_reference(x, wih, whh, b[:, 0, :])
    assert out.shape == (B, T, 2 * H), out.shape
    assert jnp.allclose(out, ref, atol=1e-5, rtol=1e-5), (
        float(jnp.max(jnp.abs(out - ref)))
    )

    print("KERNEL_OK")
</pallas_src>

<mosaic_0001>
module attributes {stable_mosaic.version = 11 : i64} {
  func.func @_birnn_kernel(%arg0: i32, %arg1: memref<64x16xf32, #tpu.memory_space<vmem>>, %arg2: memref<16x64xf32, #tpu.memory_space<vmem>>, %arg3: memref<64x64xf32, #tpu.memory_space<vmem>>, %arg4: memref<1x64xf32, #tpu.memory_space<vmem>>, %arg5: memref<64x64xf32, #tpu.memory_space<vmem>>) attributes {dimension_semantics = [#tpu.dimension_semantics<arbitrary>], iteration_bounds = array<i64: 1>, scalar_prefetch = 0 : i64, scratch_operands = 0 : i64, tpu.core_type = #tpu.core_type<tc>, window_params = [{pipeline_mode = #tpu.pipeline_mode<synchronous>, transform_indices = @transform_0, window_bounds = array<i64: 64, 16>}, {pipeline_mode = #tpu.pipeline_mode<synchronous>, transform_indices = @transform_1, window_bounds = array<i64: 16, 64>}, {pipeline_mode = #tpu.pipeline_mode<synchronous>, transform_indices = @transform_2, window_bounds = array<i64: 64, 64>}, {pipeline_mode = #tpu.pipeline_mode<synchronous>, transform_indices = @transform_3, window_bounds = array<i64: 1, 64>}, {pipeline_mode = #tpu.pipeline_mode<synchronous>, transform_indices = @transform_4, window_bounds = array<i64: 64, 64>}]} {
    %c0 = arith.constant 0 : index
    %c0_0 = arith.constant 0 : index
    %0 = vector.load %arg1[%c0, %c0_0] : memref<64x16xf32, #tpu.memory_space<vmem>>, vector<64x16xf32>
    %c0_1 = arith.constant 0 : index
    %c0_2 = arith.constant 0 : index
    %1 = vector.load %arg2[%c0_1, %c0_2] : memref<16x64xf32, #tpu.memory_space<vmem>>, vector<16x64xf32>
    %cst = arith.constant dense<0.000000e+00> : vector<64x64xf32>
    %2 = tpu.matmul %0, %1, %cst {dimension_numbers = #tpu.dot_dimension_numbers<[1], [0], [0], [1], [0, 0, 1, 1], [], []>} : vector<64x16xf32>, vector<16x64xf32>, vector<64x64xf32> -> vector<64x64xf32>
    %c0_3 = arith.constant 0 : index
    %c0_4 = arith.constant 0 : index
    %3 = vector.load %arg4[%c0_3, %c0_4] : memref<1x64xf32, #tpu.memory_space<vmem>>, vector<1x64xf32>
    %4 = vector.broadcast %3 : vector<1x64xf32> to vector<64x64xf32>
    %5 = arith.addf %2, %4 : vector<64x64xf32>
    %c0_5 = arith.constant 0 : index
    %c0_6 = arith.constant 0 : index
    %6 = vector.load %arg3[%c0_5, %c0_6] : memref<64x64xf32, #tpu.memory_space<vmem>>, vector<64x64xf32>
    %cst_7 = arith.constant 0.000000e+00 : f32
    %7 = vector.broadcast %cst_7 : f32 to vector<8x64xf32>
    %8 = vector.extract_strided_slice %5 {offsets = [0, 0], sizes = [8, 32], strides = [1, 1]} : vector<64x64xf32> to vector<8x32xf32>
    %9 = vector.extract_strided_slice %5 {offsets = [56, 32], sizes = [8, 32], strides = [1, 1]} : vector<64x64xf32> to vector<8x32xf32>
    %10 = tpu.concatenate %8, %9 in 1 : vector<8x32xf32>, vector<8x32xf32> -> vector<8x64xf32>
    %cst_8 = arith.constant dense<0.000000e+00> : vector<8x64xf32>
    %11 = tpu.matmul %7, %6, %cst_8 {dimension_numbers = #tpu.dot_dimension_numbers<[1], [0], [0], [1], [0, 0, 1, 1], [], []>} : vector<8x64xf32>, vector<64x64xf32>, vector<8x64xf32> -> vector<8x64xf32>
    %12 = arith.addf %10, %11 : vector<8x64xf32>
    %13 = math.tanh %12 : vector<8x64xf32>
    %14 = vector.extract_strided_slice %5 {offsets = [8, 0], sizes = [8, 32], strides = [1, 1]} : vector<64x64xf32> to vector<8x32xf32>
    %15 = vector.extract_strided_slice %5 {offsets = [48, 32], sizes = [8, 32], strides = [1, 1]} : vector<64x64xf32> to vector<8x32xf32>
    %16 = tpu.concatenate %14, %15 in 1 : vector<8x32xf32>, vector<8x32xf32> -> vector<8x64xf32>
    %cst_9 = arith.constant dense<0.000000e+00> : vector<8x64xf32>
    %17 = tpu.matmul %13, %6, %cst_9 {dimension_numbers = #tpu.dot_dimension_numbers<[1], [0], [0], [1], [0, 0, 1, 1], [], []>} : vector<8x64xf32>, vector<64x64xf32>, vector<8x64xf32> -> vector<8x64xf32>
    %18 = arith.addf %16, %17 : vector<8x64xf32>
    %19 = math.tanh %18 : vector<8x64xf32>
    %20 = vector.extract_strided_slice %5 {offsets = [16, 0], sizes = [8, 32], strides = [1, 1]} : vector<64x64xf32> to vector<8x32xf32>
    %21 = vector.extract_strided_slice %5 {offsets = [40, 32], sizes = [8, 32], strides = [1, 1]} : vector<64x64xf32> to vector<8x32xf32>
    %22 = tpu.concatenate %20, %21 in 1 : vector<8x32xf32>, vector<8x32xf32> -> vector<8x64xf32>
    %cst_10 = arith.constant dense<0.000000e+00> : vector<8x64xf32>
    %23 = tpu.matmul %19, %6, %cst_10 {dimension_numbers = #tpu.dot_dimension_numbers<[1], [0], [0], [1], [0, 0, 1, 1], [], []>} : vector<8x64xf32>, vector<64x64xf32>, vector<8x64xf32> -> vector<8x64xf32>
    %24 = arith.addf %22, %23 : vector<8x64xf32>
    %25 = math.tanh %24 : vector<8x64xf32>
    %26 = vector.extract_strided_slice %5 {offsets = [24, 0], sizes = [8, 32], strides = [1, 1]} : vector<64x64xf32> to vector<8x32xf32>
    %27 = vector.extract_strided_slice %5 {offsets = [32, 32], sizes = [8, 32], strides = [1, 1]} : vector<64x64xf32> to vector<8x32xf32>
    %28 = tpu.concatenate %26, %27 in 1 : vector<8x32xf32>, vector<8x32xf32> -> vector<8x64xf32>
    %cst_11 = arith.constant dense<0.000000e+00> : vector<8x64xf32>
    %29 = tpu.matmul %25, %6, %cst_11 {dimension_numbers = #tpu.dot_dimension_numbers<[1], [0], [0], [1], [0, 0, 1, 1], [], []>} : vector<8x64xf32>, vector<64x64xf32>, vector<8x64xf32> -> vector<8x64xf32>
    %30 = arith.addf %28, %29 : vector<8x64xf32>
    %31 = math.tanh %30 : vector<8x64xf32>
    %32 = vector.extract_strided_slice %5 {offsets = [32, 0], sizes = [8, 32], strides = [1, 1]} : vector<64x64xf32> to vector<8x32xf32>
    %33 = vector.extract_strided_slice %5 {offsets = [24, 32], sizes = [8, 32], strides = [1, 1]} : vector<64x64xf32> to vector<8x32xf32>
    %34 = tpu.concatenate %32, %33 in 1 : vector<8x32xf32>, vector<8x32xf32> -> vector<8x64xf32>
    %cst_12 = arith.constant dense<0.000000e+00> : vector<8x64xf32>
    %35 = tpu.matmul %31, %6, %cst_12 {dimension_numbers = #tpu.dot_dimension_numbers<[1], [0], [0], [1], [0, 0, 1, 1], [], []>} : vector<8x64xf32>, vector<64x64xf32>, vector<8x64xf32> -> vector<8x64xf32>
    %36 = arith.addf %34, %35 : vector<8x64xf32>
    %37 = math.tanh %36 : vector<8x64xf32>
    %38 = vector.extract_strided_slice %5 {offsets = [40, 0], sizes = [8, 32], strides = [1, 1]} : vector<64x64xf32> to vector<8x32xf32>
    %39 = vector.extract_strided_slice %5 {offsets = [16, 32], sizes = [8, 32], strides = [1, 1]} : vector<64x64xf32> to vector<8x32xf32>
    %40 = tpu.concatenate %38, %39 in 1 : vector<8x32xf32>, vector<8x32xf32> -> vector<8x64xf32>
    %cst_13 = arith.constant dense<0.000000e+00> : vector<8x64xf32>
    %41 = tpu.matmul %37, %6, %cst_13 {dimension_numbers = #tpu.dot_dimension_numbers<[1], [0], [0], [1], [0, 0, 1, 1], [], []>} : vector<8x64xf32>, vector<64x64xf32>, vector<8x64xf32> -> vector<8x64xf32>
    %42 = arith.addf %40, %41 : vector<8x64xf32>
    %43 = math.tanh %42 : vector<8x64xf32>
    %44 = vector.extract_strided_slice %5 {offsets = [48, 0], sizes = [8, 32], strides = [1, 1]} : vector<64x64xf32> to vector<8x32xf32>
    %45 = vector.extract_strided_slice %5 {offsets = [8, 32], sizes = [8, 32], strides = [1, 1]} : vector<64x64xf32> to vector<8x32xf32>
    %46 = tpu.concatenate %44, %45 in 1 : vector<8x32xf32>, vector<8x32xf32> -> vector<8x64xf32>
    %cst_14 = arith.constant dense<0.000000e+00> : vector<8x64xf32>
    %47 = tpu.matmul %43, %6, %cst_14 {dimension_numbers = #tpu.dot_dimension_numbers<[1], [0], [0], [1], [0, 0, 1, 1], [], []>} : vector<8x64xf32>, vector<64x64xf32>, vector<8x64xf32> -> vector<8x64xf32>
    %48 = arith.addf %46, %47 : vector<8x64xf32>
    %49 = math.tanh %48 : vector<8x64xf32>
    %50 = vector.extract_strided_slice %5 {offsets = [56, 0], sizes = [8, 32], strides = [1, 1]} : vector<64x64xf32> to vector<8x32xf32>
    %51 = vector.extract_strided_slice %5 {offsets = [0, 32], sizes = [8, 32], strides = [1, 1]} : vector<64x64xf32> to vector<8x32xf32>
    %52 = tpu.concatenate %50, %51 in 1 : vector<8x32xf32>, vector<8x32xf32> -> vector<8x64xf32>
    %cst_15 = arith.constant dense<0.000000e+00> : vector<8x64xf32>
    %53 = tpu.matmul %49, %6, %cst_15 {dimension_numbers = #tpu.dot_dimension_numbers<[1], [0], [0], [1], [0, 0, 1, 1], [], []>} : vector<8x64xf32>, vector<64x64xf32>, vector<8x64xf32> -> vector<8x64xf32>
    %54 = arith.addf %52, %53 : vector<8x64xf32>
    %55 = math.tanh %54 : vector<8x64xf32>
    %56 = vector.extract_strided_slice %13 {offsets = [0, 0], sizes = [8, 32], strides = [1, 1]} : vector<8x64xf32> to vector<8x32xf32>
    %57 = vector.extract_strided_slice %55 {offsets = [0, 32], sizes = [8, 32], strides = [1, 1]} : vector<8x64xf32> to vector<8x32xf32>
    %58 = tpu.concatenate %56, %57 in 1 : vector<8x32xf32>, vector<8x32xf32> -> vector<8x64xf32>
    %59 = vector.extract_strided_slice %19 {offsets = [0, 0], sizes = [8, 32], strides = [1, 1]} : vector<8x64xf32> to vector<8x32xf32>
    %60 = vector.extract_strided_slice %49 {offsets = [0, 32], sizes = [8, 32], strides = [1, 1]} : vector<8x64xf32> to vector<8x32xf32>
    %61 = tpu.concatenate %59, %60 in 1 : vector<8x32xf32>, vector<8x32xf32> -> vector<8x64xf32>
    %62 = vector.extract_strided_slice %25 {offsets = [0, 0], sizes = [8, 32], strides = [1, 1]} : vector<8x64xf32> to vector<8x32xf32>
    %63 = vector.extract_strided_slice %43 {offsets = [0, 32], sizes = [8, 32], strides = [1, 1]} : vector<8x64xf32> to vector<8x32xf32>
    %64 = tpu.concatenate %62, %63 in 1 : vector<8x32xf32>, vector<8x32xf32> -> vector<8x64xf32>
    %65 = vector.extract_strided_slice %31 {offsets = [0, 0], sizes = [8, 32], strides = [1, 1]} : vector<8x64xf32> to vector<8x32xf32>
    %66 = vector.extract_strided_slice %37 {offsets = [0, 32], sizes = [8, 32], strides = [1, 1]} : vector<8x64xf32> to vector<8x32xf32>
    %67 = tpu.concatenate %65, %66 in 1 : vector<8x32xf32>, vector<8x32xf32> -> vector<8x64xf32>
    %68 = vector.extract_strided_slice %37 {offsets = [0, 0], sizes = [8, 32], strides = [1, 1]} : vector<8x64xf32> to vector<8x32xf32>
    %69 = vector.extract_strided_slice %31 {offsets = [0, 32], sizes = [8, 32], strides = [1, 1]} : vector<8x64xf32> to vector<8x32xf32>
    %70 = tpu.concatenate %68, %69 in 1 : vector<8x32xf32>, vector<8x32xf32> -> vector<8x64xf32>
    %71 = vector.extract_strided_slice %43 {offsets = [0, 0], sizes = [8, 32], strides = [1, 1]} : vector<8x64xf32> to vector<8x32xf32>
    %72 = vector.extract_strided_slice %25 {offsets = [0, 32], sizes = [8, 32], strides = [1, 1]} : vector<8x64xf32> to vector<8x32xf32>
    %73 = tpu.concatenate %71, %72 in 1 : vector<8x32xf32>, vector<8x32xf32> -> vector<8x64xf32>
    %74 = vector.extract_strided_slice %49 {offsets = [0, 0], sizes = [8, 32], strides = [1, 1]} : vector<8x64xf32> to vector<8x32xf32>
    %75 = vector.extract_strided_slice %19 {offsets = [0, 32], sizes = [8, 32], strides = [1, 1]} : vector<8x64xf32> to vector<8x32xf32>
    %76 = tpu.concatenate %74, %75 in 1 : vector<8x32xf32>, vector<8x32xf32> -> vector<8x64xf32>
    %77 = vector.extract_strided_slice %55 {offsets = [0, 0], sizes = [8, 32], strides = [1, 1]} : vector<8x64xf32> to vector<8x32xf32>
    %78 = vector.extract_strided_slice %13 {offsets = [0, 32], sizes = [8, 32], strides = [1, 1]} : vector<8x64xf32> to vector<8x32xf32>
    %79 = tpu.concatenate %77, %78 in 1 : vector<8x32xf32>, vector<8x32xf32> -> vector<8x64xf32>
    %80 = tpu.concatenate %58, %61, %64, %67, %70, %73, %76, %79 in 0 : vector<8x64xf32>, vector<8x64xf32>, vector<8x64xf32>, vector<8x64xf32>, vector<8x64xf32>, vector<8x64xf32>, vector<8x64xf32>, vector<8x64xf32> -> vector<64x64xf32>
    %c0_16 = arith.constant 0 : index
    %c0_17 = arith.constant 0 : index
    %81 = vector.load %arg5[%c0_16, %c0_17] : memref<64x64xf32, #tpu.memory_space<vmem>>, vector<64x64xf32>
    tpu.vector_store %arg5[%c0_16, %c0_17], %80 {strides = array<i32>} : memref<64x64xf32, #tpu.memory_space<vmem>>, vector<64x64xf32>,
    return
  }
  func.func @transform_0(%arg0: i32) -> (i32, i32) {
    %c0_i32 = arith.constant 0 : i32
    %c0_i32_0 = arith.constant 0 : i32
    %c0_i32_1 = arith.constant 0 : i32
    return %c0_i32, %c0_i32_0 : i32, i32
  }
  func.func @transform_1(%arg0: i32) -> (i32, i32) {
    %c0_i32 = arith.constant 0 : i32
    %c0_i32_0 = arith.constant 0 : i32
    %c0_i32_1 = arith.constant 0 : i32
    return %c0_i32, %c0_i32_0 : i32, i32
  }
  func.func @transform_2(%arg0: i32) -> (i32, i32) {
    %c0_i32 = arith.constant 0 : i32
    %c0_i32_0 = arith.constant 0 : i32
    %c0_i32_1 = arith.constant 0 : i32
    return %c0_i32, %c0_i32_0 : i32, i32
  }
  func.func @transform_3(%arg0: i32) -> (i32, i32) {
    %c0_i32 = arith.constant 0 : i32
    %c0_i32_0 = arith.constant 0 : i32
    %c0_i32_1 = arith.constant 0 : i32
    return %c0_i32, %c0_i32_0 : i32, i32
  }
  func.func @transform_4(%arg0: i32) -> (i32, i32) {
    %c0_i32 = arith.constant 0 : i32
    %c0_i32_0 = arith.constant 0 : i32
    %c0_i32_1 = arith.constant 0 : i32
    return %c0_i32, %c0_i32_0 : i32, i32
  }
}

</mosaic_0001>

<bundles_post_ra>
// kernel: bidirectional_rnn.1
= control target key start
LH: loop header
LB: loop body
LE: loop exit
PB: predicated region body
PF: predicated region fallthrough
CT: control target
= control target key end

     0   :  { %vm31_vm0 = vcmask 130048   ;;  %v370_v14 = vmov 0.0   ;;  %vm105_vm1 = vcmask 261120   ;;  %vm107_vm2 = vcmask 523264   ;;  %s607_s1 = inlined_call_operand.vmem [shape: f32[16,64], index: 1, kind: input, shape index: {}]   ;;  %s608_s0 = inlined_call_operand.vmem [shape: f32[64,16], index: 0, kind: input, shape index: {}]   ;;  %s609_s2 = inlined_call_operand.vmem [shape: f32[64,64], index: 2, kind: input, shape index: {}]   ;;  %s610_s3 = inlined_call_operand.vmem [shape: f32[1,64], index: 3, kind: input, shape index: {}]   ;;  %s611_s4 = inlined_call_operand.vmem [shape: f32[64,64], index: 4, kind: output, shape index: {}]  }
   0x1   :  { %v26_v0 = vld [vmem:[%s607_s1 + $0x8] sm:$0xff]  ;;  %v25_v1 = vld [vmem:[%s607_s1] sm:$0xff]  ;;  %v23_v3 = vld [vmem:[%s608_s0 + $0x30] sm:$0xff] }
   0x2   :  { %70 = vmatpush.msra.mxu0 %v26_v0  ;;  %350 = vmatpush.msra.mxu3 %v26_v0  ;;  %v17_v2 = vld [vmem:[%s608_s0] sm:$0xff]  ;;  %v411_v4 = vld [vmem:[%s609_s2 + $0x38] sm:$0xff]  ;;  %v417_v5 = vld [vmem:[%s609_s2 + $0x30] sm:$0xff] }
   0x3   :  { %119 = vmatpush.msra.mxu1 %v411_v4  ;;  %145 = vmatpush.msra.mxu2 %v411_v4  ;;  %v425_v6 = vld [vmem:[%s609_s2 + $0x28] sm:$0xff]  ;;  %v432_v7 = vld [vmem:[%s609_s2 + $0x20] sm:$0xff]  ;;  %v440_v8 = vld [vmem:[%s609_s2 + $0x18] sm:$0xff] }
   0x4   :  { %71 = vmatpush.msra.mxu0 %v25_v1  ;;  %351 = vmatpush.msra.mxu3 %v25_v1  ;;  %v18_v9 = vld [vmem:[%s608_s0 + $0x8] sm:$0xff]  ;;  %v24_v10 = vld [vmem:[%s608_s0 + $0x38] sm:$0xff]  ;;  %v454_v11 = vld [vmem:[%s609_s2 + $0x10] sm:$0xff] }
   0x5   :  { %335 = vmatmul.msk.f32.vlgmr.msra.gmra.mxu0 %vm31_vm0, %v17_v2  ;;  %341 = vmatmul.msk.f32.vlgmr.msra.gmra.mxu3 %vm31_vm0, %v23_v3  ;;  %v464_v12 = vld [vmem:[%s609_s2 + $0x8] sm:$0xff]  ;;  %v471_v13 = vld [vmem:[%s609_s2] sm:$0xff]  ;;  %v19_v15 = vld [vmem:[%s608_s0 + $0x10] sm:$0xff] }
   0x6   :  { %120 = vmatpush.msra.mxu1 %v417_v5  ;;  %146 = vmatpush.msra.mxu2 %v417_v5  ;;  %v20_v17 = vld [vmem:[%s608_s0 + $0x18] sm:$0xff]  ;;  %v353_v18 = vld [vmem:[%s610_s3] ss:$0 sm:$0xff]  ;;  %v22_v30 = vld [vmem:[%s608_s0 + $0x28] sm:$0xff] }
   0x7   :  { %171 = vmatpush.msrb.mxu3 %v411_v4  ;;  %v21_v23 = vld [vmem:[%s608_s0 + $0x20] sm:$0xff] }
   0x8   :  { %121 = vmatpush.msra.mxu1 %v425_v6  ;;  %147 = vmatpush.msra.mxu2 %v425_v6 }
   0x9   :  { %172 = vmatpush.msrb.mxu3 %v417_v5 }
   0xa   :  { %122 = vmatpush.msra.mxu1 %v432_v7  ;;  %148 = vmatpush.msra.mxu2 %v432_v7 }
   0xb   :  { %173 = vmatpush.msrb.mxu3 %v425_v6 }
   0xc   :  { %123 = vmatpush.msra.mxu1 %v440_v8  ;;  %149 = vmatpush.msra.mxu2 %v440_v8 }
   0xd   :  { %336 = vmatmul.msk.f32.gmra.mxu0 %vm31_vm0, %v18_v9  ;;  %342 = vmatmul.msk.f32.gmra.mxu3 %vm31_vm0, %v24_v10 }
   0xe   :  { %124 = vmatpush.msra.mxu1 %v454_v11  ;;  %150 = vmatpush.msra.mxu2 %v454_v11 }
   0xf   :  { %174 = vmatpush.msrb.mxu3 %v432_v7 }
  0x10   :  { %125 = vmatpush.msra.mxu1 %v464_v12  ;;  %151 = vmatpush.msra.mxu2 %v464_v12 }
  0x11   :  { %175 = vmatpush.msrb.mxu3 %v440_v8 }
  0x12   :  { %126 = vmatpush.msra.mxu1 %v471_v13  ;;  %152 = vmatpush.msra.mxu2 %v471_v13 }
  0x13   :  { %127 = vmatmul.f32.vlgmr.msra.gmra.mxu1 %v370_v14  ;;  %176 = vmatpush.msrb.mxu3 %v454_v11 }
  0x14   :  { %197 = vmatpush.msrb.mxu1 %v411_v4  ;;  %223 = vmatpush.msrb.mxu2 %v411_v4 }
  0x15   :  { %177 = vmatpush.msrb.mxu3 %v464_v12  ;;  %337 = vmatmul.msk.f32.gmra.mxu0 %vm31_vm0, %v19_v15 }
  0x16   :  { %198 = vmatpush.msrb.mxu1 %v417_v5  ;;  %224 = vmatpush.msrb.mxu2 %v417_v5 }
  0x17   :  { %178 = vmatpush.msrb.mxu3 %v471_v13 }
  0x18   :  { %199 = vmatpush.msrb.mxu1 %v425_v6  ;;  %225 = vmatpush.msrb.mxu2 %v425_v6 }
  0x19   :  { %249 = vmatpush.msra.mxu3 %v411_v4 }
  0x1a   :  { %200 = vmatpush.msrb.mxu1 %v432_v7  ;;  %226 = vmatpush.msrb.mxu2 %v432_v7 }
  0x1b   :  { %250 = vmatpush.msra.mxu3 %v417_v5 }
  0x1c   :  { %201 = vmatpush.msrb.mxu1 %v440_v8  ;;  %227 = vmatpush.msrb.mxu2 %v440_v8 }
  0x1d   :  { %251 = vmatpush.msra.mxu3 %v425_v6  ;;  %338 = vmatmul.msk.f32.gmra.mxu0 %vm31_vm0, %v20_v17 }
  0x1e   :  { %202 = vmatpush.msrb.mxu1 %v454_v11  ;;  %228 = vmatpush.msrb.mxu2 %v454_v11 }
  0x1f   :  { %252 = vmatpush.msra.mxu3 %v432_v7 }
  0x20   :  { %203 = vmatpush.msrb.mxu1 %v464_v12  ;;  %229 = vmatpush.msrb.mxu2 %v464_v12 }
  0x21   :  { %253 = vmatpush.msra.mxu3 %v440_v8 }
  0x22   :  { %204 = vmatpush.msrb.mxu1 %v471_v13  ;;  %230 = vmatpush.msrb.mxu2 %v471_v13 }
  0x23   :  { %254 = vmatpush.msra.mxu3 %v454_v11 }
  0x24   :  { %275 = vmatpush.msra.mxu1 %v411_v4 }
  0x25   :  { %255 = vmatpush.msra.mxu3 %v464_v12  ;;  %339 = vmatmul.msk.f32.gmra.mxu0 %vm31_vm0, %v21_v23 }
  0x26   :  { %276 = vmatpush.msra.mxu1 %v417_v5 }
  0x27   :  { %256 = vmatpush.msra.mxu3 %v471_v13 }
  0x28   :  { %277 = vmatpush.msra.mxu1 %v425_v6 }
  0x2a   :  { %278 = vmatpush.msra.mxu1 %v432_v7 }
  0x2c   :  { %279 = vmatpush.msra.mxu1 %v440_v8 }
  0x2d   :  { %340 = vmatmul.msk.f32.gmra.mxu0 %vm31_vm0, %v22_v30 }
  0x2e   :  { %280 = vmatpush.msra.mxu1 %v454_v11 }
  0x30   :  { %281 = vmatpush.msra.mxu1 %v464_v12 }
  0x32   :  { %282 = vmatpush.msra.mxu1 %v471_v13 }
  0x82   :  { %v73_v16 = vpop.f32.mrf.mxu0 }
  0x83   :  { %v74_v25 = vadd.f32 %v353_v18, %v73_v16 }
  0x88   :  { %v91_v19 = vpop.f32.mrf.mxu3 }
  0x89   :  { %v92_v21 = vadd.f32 %v353_v18, %v91_v19 }
  0x8a   :  { %v76_v20 = vpop.f32.mrf.mxu0 }
  0x8b   :  { %v77_v22 = vadd.f32 %v353_v18, %v76_v20 }
  0x8d   :  { %v529_v24 = vsel %vm105_vm1, %v92_v21, %v77_v22  ;;  %v133_v34 = vsel %vm105_vm1, %v77_v22, %v92_v21 }
  0x90   :  { %v94_v26 = vpop.f32.mrf.mxu3  ;;  %v128_v28 = vpop.f32.mrf.mxu1 }
  0x91   :  { %v95_v27 = vadd.f32 %v353_v18, %v94_v26 }
  0x92   :  { %v79_v38 = vpop.f32.mrf.mxu0 }
  0x93   :  { %v106_v29 = vsel %vm105_vm1, %v74_v25, %v95_v27  ;;  %v537_v31 = vsel %vm105_vm1, %v95_v27, %v74_v25  ;;  %v80_v46 = vadd.f32 %v353_v18, %v79_v38 }
  0x94   :  { %v131_v32 = vadd.f32 %v128_v28, %v106_v29 }
  0x96   :  { %354 = vtanh.f32 %v131_v32 }
  0x9a   :  { %v82_v39 = vpop.f32.mrf.mxu0 }
  0x9b   :  { %v83_v41 = vadd.f32 %v353_v18, %v82_v39 }
  0x9c   :  { %v540_v33 = vpop.eup %354 }
  0x9d   :  { %343 = vmatmul.msk.f32.vlgmr.msra.gmra.mxu2 %vm107_vm2, %v540_v33 }
  0x9e   :  { %301 = vmatpush.msra.mxu2 %v411_v4 }
  0xa0   :  { %302 = vmatpush.msra.mxu2 %v417_v5 }
  0xa2   :  { %303 = vmatpush.msra.mxu2 %v425_v6  ;;  %v85_v40 = vpop.f32.mrf.mxu0 }
  0xa3   :  { %v86_v42 = vadd.f32 %v353_v18, %v85_v40 }
  0xa4   :  { %304 = vmatpush.msra.mxu2 %v432_v7 }
  0xa5   :  { %v185_v43 = vsel %vm105_vm1, %v83_v41, %v86_v42  ;;  %v211_v44 = vsel %vm105_vm1, %v86_v42, %v83_v41 }
  0xa6   :  { %305 = vmatpush.msra.mxu2 %v440_v8 }
  0xa8   :  { %306 = vmatpush.msra.mxu2 %v454_v11 }
  0xaa   :  { %307 = vmatpush.msra.mxu2 %v464_v12  ;;  %v88_v45 = vpop.f32.mrf.mxu0 }
  0xab   :  { %v89_v47 = vadd.f32 %v353_v18, %v88_v45 }
  0xac   :  { %308 = vmatpush.msra.mxu2 %v471_v13 }
  0xad   :  { %v159_v48 = vsel %vm105_vm1, %v80_v46, %v89_v47  ;;  %v237_v60 = vsel %vm105_vm1, %v89_v47, %v80_v46 }
 0x120   :  { %v154_v35 = vpop.f32.mrf.mxu2 }
 0x121   :  { %v157_v36 = vadd.f32 %v154_v35, %v133_v34 }
 0x123   :  { %356 = vtanh.f32 %v157_v36 }
 0x129   :  { %v357_v37 = vpop.eup %356 }
 0x12a   :  { %344 = vmatmul.msk.f32.vlgmr.msrb.gmra.mxu3 %vm107_vm2, %v357_v37 }
 0x1ad   :  { %v180_v49 = vpop.f32.mrf.mxu3 }
 0x1ae   :  { %v183_v50 = vadd.f32 %v180_v49, %v159_v48 }
 0x1b0   :  { %358 = vtanh.f32 %v183_v50 }
 0x1b6   :  { %v359_v51 = vpop.eup %358 }
 0x1b7   :  { %345 = vmatmul.msk.f32.vlgmr.msrb.gmra.mxu1 %vm107_vm2, %v359_v51 }
 0x234   :  { %v206_v52 = vpop.f32.mrf.mxu1 }
 0x235   :  { %v209_v53 = vadd.f32 %v206_v52, %v185_v43 }
 0x237   :  { %360 = vtanh.f32 %v209_v53 }
 0x23d   :  { %v361_v54 = vpop.eup %360 }
 0x23e   :  { %346 = vmatmul.msk.f32.vlgmr.msrb.gmra.mxu2 %vm107_vm2, %v361_v54 }
 0x2c1   :  { %v232_v55 = vpop.f32.mrf.mxu2 }
 0x2c2   :  { %v235_v56 = vadd.f32 %v232_v55, %v211_v44 }
 0x2c4   :  { %362 = vtanh.f32 %v235_v56 }
 0x2ca   :  { %v363_v57 = vpop.eup %362 }
 0x2cb   :  { %v318_v58 = vsel %vm105_vm1, %v361_v54, %v363_v57  ;;  %v319_v59 = vsel %vm105_vm1, %v363_v57, %v361_v54  ;;  %347 = vmatmul.msk.f32.vlgmr.msra.gmra.mxu3 %vm107_vm2, %v363_v57 }
 0x2cc   :  { %326 = vst.msk [vmem:[%s611_s4 + $0x18] sm:$0xff] %vm107_vm2, %v318_v58 }
 0x2cd   :  { %327 = vst.msk [vmem:[%s611_s4 + $0x20] sm:$0xff] %vm107_vm2, %v319_v59 }
 0x34e   :  { %v258_v61 = vpop.f32.mrf.mxu3 }
 0x34f   :  { %v261_v62 = vadd.f32 %v258_v61, %v237_v60 }
 0x351   :  { %364 = vtanh.f32 %v261_v62 }
 0x357   :  { %v365_v63 = vpop.eup %364 }
 0x358   :  { %v317_v0 = vsel %vm105_vm1, %v359_v51, %v365_v63  ;;  %v320_v1 = vsel %vm105_vm1, %v365_v63, %v359_v51  ;;  %348 = vmatmul.msk.f32.vlgmr.msra.gmra.mxu1 %vm107_vm2, %v365_v63 }
 0x359   :  { %325 = vst.msk [vmem:[%s611_s4 + $0x10] sm:$0xff] %vm107_vm2, %v317_v0 }
 0x35a   :  { %328 = vst.msk [vmem:[%s611_s4 + $0x28] sm:$0xff] %vm107_vm2, %v320_v1 }
 0x3d5   :  { %v284_v2 = vpop.f32.mrf.mxu1 }
 0x3d6   :  { %v287_v3 = vadd.f32 %v284_v2, %v529_v24 }
 0x3d8   :  { %366 = vtanh.f32 %v287_v3 }
 0x3de   :  { %v367_v4 = vpop.eup %366 }
 0x3df   :  { %v316_v5 = vsel %vm105_vm1, %v357_v37, %v367_v4  ;;  %v321_v6 = vsel %vm105_vm1, %v367_v4, %v357_v37  ;;  %349 = vmatmul.msk.f32.vlgmr.msra.gmra.mxu2 %vm107_vm2, %v367_v4 }
 0x3e0   :  { %324 = vst.msk [vmem:[%s611_s4 + $0x8] sm:$0xff] %vm107_vm2, %v316_v5 }
 0x3e1   :  { %329 = vst.msk [vmem:[%s611_s4 + $0x30] sm:$0xff] %vm107_vm2, %v321_v6 }
 0x462   :  { %v310_v7 = vpop.f32.mrf.mxu2 }
 0x463   :  { %v313_v8 = vadd.f32 %v310_v7, %v537_v31 }
 0x465   :  { %368 = vtanh.f32 %v313_v8 }
 0x46b   :  { %v369_v9 = vpop.eup %368 }
 0x46c   :  { %v315_v10 = vsel %vm105_vm1, %v540_v33, %v369_v9  ;;  %v322_v11 = vsel %vm105_vm1, %v369_v9, %v540_v33 }
 0x46d   :  { %323 = vst.msk [vmem:[%s611_s4] sm:$0xff] %vm107_vm2, %v315_v10 }
 0x46e   :  { %330 = vst.msk [vmem:[%s611_s4 + $0x38] sm:$0xff] %vm107_vm2, %v322_v11 }

</bundles_post_ra>
